<compile_context>
chip_gen: v5e
topology: v5e:2x2
jax: 0.10.0
libtpu: 0.0.40
codegen_flags: <defaults>
</compile_context>

<pallas_src>
import functools

import jax
import jax.numpy as jnp
from jax import lax
from jax.experimental import pallas as pl
from jax.experimental.pallas import tpu as pltpu

LANES = 128
SUBLANES = 8
# DMA tile: 8192 rows x 128 lanes x 4 B = 4 MiB per f32 input tile.
# Double-buffered (2 inputs x 2 buffers) -> 16 MiB of VMEM for streaming.
TARGET_TILE_ROWS = 8192
# In-kernel compute chunk: keeps each full-size f32 intermediate of the
# elementwise chain at 512*128*4 B = 256 KiB instead of tile-sized.
CHUNK_ROWS = 512


def _round_up(x, m):
    return ((x + m - 1) // m) * m


def _bce_partial_kernel(pred_ref, gt_ref, out_ref, *, tile_rows, chunk_rows,
                        full_rows, rem_cols, needs_mask):
    """Writes one lane-dense (8, 128) f32 partial sum per grid step."""
    i = pl.program_id(0)
    n_chunks = tile_rows // chunk_rows

    def chunk_partial(c, masked):
        if isinstance(c, int):
            r0 = c * chunk_rows
        else:
            r0 = pl.multiple_of(c * chunk_rows, chunk_rows)
        x = pred_ref[pl.ds(r0, chunk_rows), :].astype(jnp.float32)
        y = gt_ref[pl.ds(r0, chunk_rows), :].astype(jnp.float32)
        # Numerically stable BCE-with-logits (matches torch.nn.BCEWithLogitsLoss):
        #   loss = max(x, 0) - x*y + log1p(exp(-|x|))
        loss = jnp.maximum(x, 0.0) - x * y + jnp.log1p(jnp.exp(-jnp.abs(x)))
        if masked:
            # Row-level comparison (no int32 flat-index overflow for
            # n < 2**31 * 128); only the boundary row needs lane ids.
            row_ids = (lax.broadcasted_iota(jnp.int32, (chunk_rows, LANES), 0)
                       + (i * tile_rows + r0))
            valid = row_ids < full_rows
            if rem_cols:
                col_ids = lax.broadcasted_iota(jnp.int32, (chunk_rows, LANES), 1)
                valid = valid | ((row_ids == full_rows) & (col_ids < rem_cols))
            loss = jnp.where(valid, loss, 0.0)
        # Fold sublane groups with pure VPU adds (layout-free reshape) down to
        # a single (8, 128) vreg.
        return jnp.sum(loss.reshape(chunk_rows // SUBLANES, SUBLANES, LANES), axis=0)

    def tile_partial(masked):
        if n_chunks == 1:
            return chunk_partial(0, masked)
        return lax.fori_loop(
            0, n_chunks,
            lambda c, acc: acc + chunk_partial(c, masked),
            jnp.zeros((SUBLANES, LANES), jnp.float32))

    if not needs_mask:
        out_ref[...] = tile_partial(False)
    else:
        last = pl.num_programs(0) - 1

        # The ragged/padded tail lives only in the final block: keep the
        # iota/compare/select cost off the other N-1 grid steps.
        @pl.when(i != last)
        def _():
            out_ref[...] = tile_partial(False)

        @pl.when(i == last)
        def _():
            out_ref[...] = tile_partial(True)


def bce_with_logits_mean(pred, gt, *, max_tile_rows=TARGET_TILE_ROWS):
    """Mean-reduced BCE-with-logits loss computed by a Pallas TPU kernel."""
    assert pred.shape == gt.shape, "pred/gt must have identical shapes"
    n = pred.size
    if n == 0:
        # torch.nn.BCEWithLogitsLoss(reduction='mean') returns NaN on empty input.
        return jnp.float32(jnp.nan)

    # Keep native dtype in HBM; cast happens inside the kernel.
    pred_flat = jnp.ravel(pred)
    gt_flat = jnp.ravel(gt)

    # Zero-copy path when lane-aligned and at least one (8,128) tile: the
    # reshape to (rows, 128) is free; ragged rows are handled by the in-kernel
    # mask on the final block. Only pad (an HBM copy) for lane-unaligned or
    # tiny inputs.
    padded_n = max(_round_up(n, LANES), SUBLANES * LANES)
    if padded_n != n:
        pred_flat = jnp.pad(pred_flat, (0, padded_n - n))
        gt_flat = jnp.pad(gt_flat, (0, padded_n - n))
    rows = padded_n // LANES            # >= SUBLANES

    pred2d = pred_flat.reshape(rows, LANES)
    gt2d = gt_flat.reshape(rows, LANES)

    # Tile selection: large tiles to amortize per-grid-step pipeline overhead,
    # never larger than the (8-aligned) row count so block <= array.
    target = max(SUBLANES, (max_tile_rows // SUBLANES) * SUBLANES)
    tile_rows = min(target, (rows // SUBLANES) * SUBLANES)
    if tile_rows >= CHUNK_ROWS:
        tile_rows = (tile_rows // CHUNK_ROWS) * CHUNK_ROWS
        chunk_rows = CHUNK_ROWS
    else:
        chunk_rows = tile_rows

    grid = pl.cdiv(rows, tile_rows)
    # Mask only if the grid covers more elements than the true count
    # (lane pad and/or ragged final block); applied on the last block only.
    needs_mask = grid * tile_rows * LANES > n
    full_rows = n // LANES              # rows that are fully valid
    rem_cols = n % LANES                # valid lanes in the boundary row

    in_itembytes = jnp.dtype(pred.dtype).itemsize + jnp.dtype(gt.dtype).itemsize
    # Raise scoped-VMEM enough for the double-buffered input tiles + headroom,
    # but stay well under v7x's 64 MiB physical VMEM (fine on v5e/v6e 128 MiB).
    vmem_limit = int(min(max(2 * tile_rows * LANES * in_itembytes + (8 << 20),
                             32 << 20), 56 << 20))

    kernel = functools.partial(
        _bce_partial_kernel, tile_rows=tile_rows, chunk_rows=chunk_rows,
        full_rows=full_rows, rem_cols=rem_cols, needs_mask=needs_mask)

    in_spec = pl.BlockSpec((tile_rows, LANES), lambda i: (i, 0))

    partials = pl.pallas_call(
        kernel,
        out_shape=jax.ShapeDtypeStruct((grid * SUBLANES, LANES), jnp.float32),
        grid_spec=pltpu.PrefetchScalarGridSpec(
            num_scalar_prefetch=0,
            grid=(grid,),
            in_specs=[in_spec, in_spec],
            out_specs=pl.BlockSpec((SUBLANES, LANES), lambda i: (i, 0)),
        ),
        compiler_params=pltpu.CompilerParams(
            # Each grid step writes its own partial block, so the grid axis can
            # be sharded across v7x's two TensorCores.
            dimension_semantics=("parallel",),
            vmem_limit_bytes=vmem_limit,
        ),
        cost_estimate=pl.CostEstimate(
            flops=8 * rows * LANES,
            transcendentals=2 * rows * LANES,
            bytes_accessed=rows * LANES * in_itembytes
            + grid * SUBLANES * LANES * 4,
        ),
    )(pred2d, gt2d)

    # Tiny final reduction over the [grid*8, 128] partials; mean over TRUE n.
    return jnp.sum(partials, dtype=jnp.float32) / jnp.float32(n)


def bce_with_logits_mean_ref(pred, gt):
    x = pred.astype(jnp.float32)
    y = gt.astype(jnp.float32)
    loss = jnp.maximum(x, 0.0) - x * y + jnp.log1p(jnp.exp(-jnp.abs(x)))
    return jnp.mean(loss)


if __name__ == "__main__":
    key = jax.random.PRNGKey(0)
    k1, k2, k3, k4, k5, k6, k7, k8 = jax.random.split(key, 8)

    # 1) NCHW-style input as the PyTorch module would see it (lane-aligned,
    #    zero-copy path, no mask).
    pred = jax.random.normal(k1, (2, 4, 16, 16), dtype=jnp.float32)
    gt = (jax.random.uniform(k2, (2, 4, 16, 16)) > 0.5).astype(jnp.float32)
    loss = jax.block_until_ready(bce_with_logits_mean(pred, gt))
    ref = bce_with_logits_mean_ref(pred, gt)
    assert jnp.allclose(loss, ref, rtol=1e-5, atol=1e-6), (loss, ref)

    # 2) Ragged, lane-unaligned shape (pad + last-block mask, single grid step).
    pred_r = jax.random.normal(k3, (3, 5, 7, 9), dtype=jnp.float32)
    gt_r = (jax.random.uniform(k4, (3, 5, 7, 9)) > 0.5).astype(jnp.float32)
    loss_r = jax.block_until_ready(bce_with_logits_mean(pred_r, gt_r))
    ref_r = bce_with_logits_mean_ref(pred_r, gt_r)
    assert jnp.allclose(loss_r, ref_r, rtol=1e-5, atol=1e-6), (loss_r, ref_r)

    # 3) Multi-step grid with ragged final block + boundary-lane mask
    #    (small max_tile_rows override to exercise the pl.when gating).
    pred_m = jax.random.normal(k5, (7, 555), dtype=jnp.float32)
    gt_m = (jax.random.uniform(k6, (7, 555)) > 0.5).astype(jnp.float32)
    loss_m = jax.block_until_ready(
        bce_with_logits_mean(pred_m, gt_m, max_tile_rows=16))
    ref_m = bce_with_logits_mean_ref(pred_m, gt_m)
    assert jnp.allclose(loss_m, ref_m, rtol=1e-5, atol=1e-6), (loss_m, ref_m)

    # 4) Large-enough lane-aligned input to exercise the multi-chunk fori_loop
    #    path, a multi-step grid, and a ragged masked last block (zero-copy).
    pred_b = jax.random.normal(k7, (2, 4, 128, 160), dtype=jnp.float32)
    gt_b = (jax.random.uniform(k8, (2, 4, 128, 160)) > 0.5).astype(jnp.float32)
    loss_b = jax.block_until_ready(bce_with_logits_mean(pred_b, gt_b))
    ref_b = bce_with_logits_mean_ref(pred_b, gt_b)
    assert jnp.allclose(loss_b, ref_b, rtol=2e-5, atol=1e-6), (loss_b, ref_b)

    print("KERNEL_OK")
</pallas_src>

<mosaic_0001>
module attributes {stable_mosaic.version = 11 : i64} {
  func.func @_bce_partial_kernel(%arg0: i32, %arg1: memref<16x128xf32, #tpu.memory_space<vmem>>, %arg2: memref<16x128xf32, #tpu.memory_space<vmem>>, %arg3: memref<8x128xf32, #tpu.memory_space<vmem>>) attributes {dimension_semantics = [#tpu.dimension_semantics<parallel>], iteration_bounds = array<i64: 1>, scalar_prefetch = 0 : i64, scratch_operands = 0 : i64, tpu.core_type = #tpu.core_type<tc>, window_params = [{transform_indices = @transform_0, window_bounds = array<i64: 16, 128>}, {transform_indices = @transform_1, window_bounds = array<i64: 16, 128>}, {transform_indices = @transform_2, window_bounds = array<i64: 8, 128>}]} {
    %c0 = arith.constant 0 : index
    %c0_0 = arith.constant 0 : index
    %0 = vector.load %arg1[%c0, %c0_0] : memref<16x128xf32, #tpu.memory_space<vmem>>, vector<16x128xf32>
    %c0_1 = arith.constant 0 : index
    %c0_2 = arith.constant 0 : index
    %1 = vector.load %arg2[%c0_1, %c0_2] : memref<16x128xf32, #tpu.memory_space<vmem>>, vector<16x128xf32>
    %cst = arith.constant 0.000000e+00 : f32
    %2 = vector.broadcast %cst : f32 to vector<16x128xf32>
    %3 = arith.maximumf %0, %2 : vector<16x128xf32>
    %4 = arith.mulf %0, %1 : vector<16x128xf32>
    %5 = arith.subf %3, %4 : vector<16x128xf32>
    %6 = math.absf %0 : vector<16x128xf32>
    %cst_3 = arith.constant 0.000000e+00 : f32
    %7 = vector.broadcast %cst_3 : f32 to vector<16x128xf32>
    %8 = arith.subf %7, %6 : vector<16x128xf32>
    %9 = math.exp %8 : vector<16x128xf32>
    %10 = math.log1p %9 : vector<16x128xf32>
    %11 = arith.addf %5, %10 : vector<16x128xf32>
    %12 = vector.shape_cast %11 : vector<16x128xf32> to vector<2x8x128xf32>
    %cst_4 = arith.constant dense<0.000000e+00> : vector<8x128xf32>
    %13 = vector.multi_reduction <add>, %12, %cst_4 [0] : vector<2x8x128xf32> to vector<8x128xf32>
    %c0_5 = arith.constant 0 : index
    %c0_6 = arith.constant 0 : index
    %14 = vector.load %arg3[%c0_5, %c0_6] : memref<8x128xf32, #tpu.memory_space<vmem>>, vector<8x128xf32>
    tpu.vector_store %arg3[%c0_5, %c0_6], %13 {strides = array<i32>} : memref<8x128xf32, #tpu.memory_space<vmem>>, vector<8x128xf32>,
    return
  }
  func.func @transform_0(%arg0: i32) -> (i32, i32) {
    %c0_i32 = arith.constant 0 : i32
    %c0_i32_0 = arith.constant 0 : i32
    return %arg0, %c0_i32 : i32, i32
  }
  func.func @transform_1(%arg0: i32) -> (i32, i32) {
    %c0_i32 = arith.constant 0 : i32
    %c0_i32_0 = arith.constant 0 : i32
    return %arg0, %c0_i32 : i32, i32
  }
  func.func @transform_2(%arg0: i32) -> (i32, i32) {
    %c0_i32 = arith.constant 0 : i32
    %c0_i32_0 = arith.constant 0 : i32
    return %arg0, %c0_i32 : i32, i32
  }
}

</mosaic_0001>

<bundles_post_ra>
// kernel: tpu_custom_call.1
= control target key start
LH: loop header
LB: loop body
LE: loop exit
PB: predicated region body
PF: predicated region fallthrough
CT: control target
= control target key end

     0   :  { %7 = vsyncpa [#allocation3], 0  ;;  %s222_s0 = inlined_call_operand.hbm [shape: f32[16,128], index: 0, kind: input, shape index: {}]   ;;  %s223_s1 = inlined_call_operand.hbm [shape: f32[16,128], index: 1, kind: input, shape index: {}]   ;;  %s224_s2 = inlined_call_operand.hbm [shape: f32[8,128], index: 2, kind: output, shape index: {}]  }
   0x1   :  { %8 = vsyncpa [#allocation6], 0 }
   0x2   :  { %9 = vsyncpa [#allocation4], 0  ;;  %s14_s11 = sshll.u32 %s222_s0, 4  ;;  %s193_s12 = smov [#allocation2]   ;;  %s15_s11 = int_to_ptr.hbm [resolvable:$true] %s14_s11 }
   0x3   :  { %s16_s13 = sshll.u32 %s193_s12, 4  ;;  %s27_s16 = sshll.u32 %s223_s1, 4  ;;  %s17_s13 = int_to_ptr.vmem [resolvable:$true] %s16_s13  ;;  %s28_s16 = int_to_ptr.hbm [resolvable:$true] %s27_s16 }
   0x4   :  { %s194_s17 = smov 128   ;;  %s195_s18 = smov 8  }
   0x5   :  { %22 = dma.hbm_to_vmem [thread:$0]  %s15_s11, 256, %s17_s13, [#allocation3], %s194_s17, %s194_s17, %s195_s18  }
   0x6   :  { %s196_s19 = smov [#allocation5]  }
   0x7   :  { %s29_s20 = sshll.u32 %s196_s19, 4  ;;  %s30_s20 = int_to_ptr.vmem [resolvable:$true] %s29_s20 }
   0x8   :  { %35 = dma.hbm_to_vmem [thread:$0]  %s28_s16, 256, %s30_s20, [#allocation6], %s194_s17, %s194_s17, %s195_s18  }
   0x9   :  { %187 = dma.done.wait [#allocation3], 256  }
   0xa   :  { %188 = vsyncadd [#allocation3], 4294967040 }
   0xb   :  { %189 = dma.done.wait [#allocation6], 256  }
   0xc   :  { %190 = vsyncadd [#allocation6], 4294967040  ;;  %v44_v0 = vld [vmem:[#allocation2] sm:$0xff]  ;;  %v45_v1 = vld [vmem:[#allocation2 + $0x8] sm:$0xff]  ;;  %s197_s0 = smov [#allocation7]   ;;  %s91_s23 = sshll.u32 %s224_s2, 4  ;;  %s92_s23 = int_to_ptr.hbm [resolvable:$true] %s91_s23 }
   0xd   :  { %v54_v2 = vand.u32 2147483647, %v44_v0  ;;  %v55_v3 = vand.u32 2147483647, %v45_v1  ;;  %v46_v12 = vld [vmem:[#allocation5] sm:$0xff]  ;;  %v47_v15 = vld [vmem:[#allocation5 + $0x8] sm:$0xff] }
   0xe   :  { %v48_v17 = vmax.f32 %v44_v0, 0.0  ;;  %v50_v18 = vmul.f32 %v46_v12, %v44_v0  ;;  %v49_v21 = vmax.f32 %v45_v1, 0.0  ;;  %v51_v22 = vmul.f32 %v47_v15, %v45_v1  ;;  %s89_s1 = sshll.u32 %s197_s0, 4  ;;  %s90_s1 = int_to_ptr.vmem [resolvable:$true] %s89_s1 }
   0xf   :  { %v56_v4 = vsub.f32 0.0, %v54_v2  ;;  %v57_v5 = vsub.f32 0.0, %v55_v3 }
  0x10   :  { %v52_v26 = vsub.f32 %v48_v17, %v50_v18  ;;  %v53_v29 = vsub.f32 %v49_v21, %v51_v22 }
  0x11   :  { %v58_v6 = vmul.f32 1.442695, %v56_v4  ;;  %v60_v7 = vmul.f32 1.442695, %v57_v5 }
  0x13   :  { %107 = vpow2.f32 %v58_v6 }
  0x14   :  { %109 = vpow2.f32 %v60_v7 }
  0x19   :  { %v108_v8 = vpop.eup %107 }
  0x1a   :  { %v110_v9 = vpop.eup %109  ;;  %v62_v10 = vadd.f32 1.0, %v108_v8  ;;  %v65_v11 = vmul.f32 -0.5, %v108_v8  ;;  %v68_v19 = vand.u32 2147483647, %v108_v8 }
  0x1b   :  { %v71_v13 = vadd.f32 1.0, %v110_v9  ;;  %v74_v14 = vmul.f32 -0.5, %v110_v9  ;;  %v77_v23 = vand.u32 2147483647, %v110_v9 }
  0x1c   :  { %111 = vlog2.f32 %v62_v10  ;;  %v66_v16 = vadd.f32 1.0, %v65_v11  ;;  %vm69_vm0 = vcmp.lt.f32.partialorder %v68_v19, 0.0004427343 }
  0x1d   :  { %113 = vlog2.f32 %v71_v13  ;;  %v75_v20 = vadd.f32 1.0, %v74_v14  ;;  %vm78_vm1 = vcmp.lt.f32.partialorder %v77_v23, 0.0004427343 }
  0x1e   :  { %v67_v24 = vmul.f32 %v108_v8, %v66_v16 }
  0x1f   :  { %v76_v27 = vmul.f32 %v110_v9, %v75_v20 }
  0x22   :  { %v112_v25 = vpop.eup %111 }
  0x23   :  { %v114_v28 = vpop.eup %113  ;;  %v64_v30 = vmul.f32 0.6931472, %v112_v25 }
  0x24   :  { %v73_v31 = vmul.f32 0.6931472, %v114_v28 }
  0x25   :  { %v70_v32 = vsel %vm69_vm0, %v67_v24, %v64_v30 }
  0x26   :  { %v79_v33 = vsel %vm78_vm1, %v76_v27, %v73_v31  ;;  %v80_v34 = vadd.f32 %v70_v32, %v52_v26 }
  0x27   :  { %v81_v35 = vadd.f32 %v79_v33, %v53_v29 }
  0x29   :  { %v82_v36 = vadd.f32 %v81_v35, %v80_v34 }
  0x2b   :  { %83 = vst [vmem:[#allocation7] sm:$0xff] %v82_v36 }
  0x2c   :  { %94 = dma.vmem_to_hbm [thread:$0]  %s90_s1, 128, %s92_s23, [#allocation4]  }
  0x2d   :  { %191 = dma.done.wait [#allocation4], 128  }
  0x2e   :  { %192 = vsyncadd [#allocation4], 4294967168 }
  0x2f   :  { %99 = vsyncpa [#allocation3], 1 }
  0x30   :  { %100 = vsyncpa [#allocation6], 1 }
  0x31   :  { %101 = vsyncpa [#allocation4], 1 }

</bundles_post_ra>
